<compile_context>
chip_gen: v7x
topology: tpu7x:2x2x1
jax: 0.10.0
libtpu: 0.0.40
codegen_flags: <defaults>
</compile_context>

<pallas_src>
import math

import jax
import jax.numpy as jnp
from jax.experimental import pallas as pl
from jax.experimental.pallas import tpu as pltpu


# --------------------------------------------------------------------------- #
# Helpers
# --------------------------------------------------------------------------- #
def _round_up(n, m):
    return ((n + m - 1) // m) * m


def _pad_2d(a, rows, cols):
    r, c = a.shape
    if r == rows and c == cols:
        return a
    return jnp.pad(a, ((0, rows - r), (0, cols - c)))


def _largest_divisor(n, candidates):
    for c in candidates:
        if n % c == 0:
            return c
    return n


def _vmem_limit_bytes():
    """Generation-derived scoped-VMEM budget.

    ~3/4 of physical VMEM, capped at 100 MiB:
      v5e/v6e (128 MiB physical) -> 96 MiB, v7x (64 MiB physical) -> 48 MiB.
    """
    try:
        cap = int(pltpu.get_tpu_info().vmem_capacity_bytes)
    except Exception:
        cap = 64 * 1024 * 1024
    return int(min(cap * 3 // 4, 100 * 1024 * 1024))


# --------------------------------------------------------------------------- #
# Kernel 1: dense  out = x @ W + b   (optionally writes a column of ones)
# --------------------------------------------------------------------------- #
def _make_dense_kernel(ones_col):
    def kernel(x_ref, w_ref, b_ref, out_ref):
        acc = jnp.dot(x_ref[...], w_ref[...], preferred_element_type=jnp.float32)
        acc = acc + b_ref[...]
        if ones_col is not None:
            # Plant a column of ones in a spare zero-padded lane; the aggregation
            # matmul then produces the adjacency row sums in that output column.
            col = jax.lax.broadcasted_iota(jnp.int32, acc.shape, 1)
            acc = jnp.where(col == ones_col, 1.0, acc)
        out_ref[...] = acc.astype(out_ref.dtype)

    return kernel


def _dense(x_p, w_p, b_p, out_dtype, tm, vmem_limit, ones_col=None):
    n_rows, k_dim = x_p.shape
    f_out = w_p.shape[1]
    return pl.pallas_call(
        _make_dense_kernel(ones_col),
        out_shape=jax.ShapeDtypeStruct((n_rows, f_out), out_dtype),
        grid=(n_rows // tm,),
        in_specs=[
            pl.BlockSpec((tm, k_dim), lambda i: (i, 0)),
            # TODO(synk): for very large in_f*out_f, add an out-column grid axis
            # instead of keeping W fully resident (double-buffered).
            pl.BlockSpec((k_dim, f_out), lambda i: (0, 0)),
            pl.BlockSpec((1, f_out), lambda i: (0, 0)),
        ],
        out_specs=pl.BlockSpec((tm, f_out), lambda i: (i, 0)),
        compiler_params=pltpu.CompilerParams(
            dimension_semantics=("parallel",),
            vmem_limit_bytes=vmem_limit,
        ),
    )(x_p, w_p, b_p)


# --------------------------------------------------------------------------- #
# Kernel 2: out = rownorm(adj) @ feat + bias  (deferred normalization)
# --------------------------------------------------------------------------- #
def _make_agg_kernel(tk, normalize, rowsum_col, feat_resident, approx_recip):
    use_ones_col = normalize and (rowsum_col is not None)
    use_scratch = normalize and not use_ones_col

    def kernel(adj_ref, feat_ref, b_ref, out_ref, *scratch):
        k = pl.program_id(1)
        nk = pl.num_programs(1)

        @pl.when(k == 0)
        def _init():
            out_ref[...] = jnp.zeros_like(out_ref)
            if use_scratch:
                scratch[0][...] = jnp.zeros_like(scratch[0])

        adj = adj_ref[...]                                    # (tm, tk)
        if feat_resident:
            off = pl.multiple_of(k * tk, tk)
            feat = feat_ref[pl.ds(off, tk), :]                # (tk, F) resident slice
        else:
            feat = feat_ref[...]                              # (tk, F) pipelined tile
        out_ref[...] += jnp.dot(adj, feat, preferred_element_type=jnp.float32)
        if use_scratch:
            # Fallback only (no spare padded lane): XLU lane reduce per k step.
            scratch[0][...] += jnp.sum(adj.astype(jnp.float32), axis=1,
                                       keepdims=True)

        @pl.when(k == nk - 1)
        def _finalize():
            out = out_ref[...]
            if normalize:
                if use_ones_col:
                    # Row sums were produced by the MXU in column `rowsum_col`.
                    col = jax.lax.broadcasted_iota(jnp.int32, out.shape, 1)
                    rs = jnp.sum(jnp.where(col == rowsum_col, out, 0.0),
                                 axis=1, keepdims=True)
                else:
                    rs = scratch[0][...]
                if approx_recip:
                    r_raw = pl.reciprocal(rs, approx=True)    # EUP slot
                else:
                    r_raw = 1.0 / rs                          # exact (bit-compat path)
                # Zero-degree rows stay exactly 0 (inf -> 0 in the torch code).
                r_inv = jnp.where(rs == 0.0, 0.0, r_raw)
                out = out * r_inv
            out_ref[...] = out + b_ref[...]

    return kernel


def _aggregate(adj_p, feat, b_p, tm, tk, normalize, rowsum_col, feat_resident,
               approx_recip, vmem_limit):
    n_pad = adj_p.shape[0]
    f_cols = feat.shape[1]
    if feat_resident:
        feat_spec = pl.BlockSpec((n_pad, f_cols), lambda i, k: (0, 0))
    else:
        feat_spec = pl.BlockSpec((tk, f_cols), lambda i, k: (k, 0))
    scratch = []
    if normalize and rowsum_col is None:
        scratch = [pltpu.VMEM((tm, 1), jnp.float32)]
    return pl.pallas_call(
        _make_agg_kernel(tk, normalize, rowsum_col, feat_resident, approx_recip),
        out_shape=jax.ShapeDtypeStruct((n_pad, f_cols), jnp.float32),
        grid=(n_pad // tm, n_pad // tk),
        in_specs=[
            pl.BlockSpec((tm, tk), lambda i, k: (i, k)),      # adj tile (pipelined)
            feat_spec,                                        # feature matrix
            pl.BlockSpec((1, f_cols), lambda i, k: (0, 0)),   # bias row
        ],
        out_specs=pl.BlockSpec((tm, f_cols), lambda i, k: (i, 0)),
        scratch_shapes=scratch,
        compiler_params=pltpu.CompilerParams(
            dimension_semantics=("parallel", "arbitrary"),
            vmem_limit_bytes=vmem_limit,
        ),
    )(adj_p, feat, b_p)


# --------------------------------------------------------------------------- #
# Wrapper
# --------------------------------------------------------------------------- #
def graph_convolution(x, weight, adj, bias=None, should_normalize=True,
                      compute_dtype=jnp.float32, support_resident=None):
    """Forward pass of the GraphConvolution module (dense adjacency).

    compute_dtype: dtype fed to the O(N^2) aggregation matmul (adjacency and
      feature matrix). float32 is bit-comparable to the reference; bfloat16
      halves adj HBM traffic and uses the native bf16 MXU rate (f32 accumulate).
    support_resident: force the aggregation feature matrix VMEM-resident (True)
      or k-tiled (False); None -> chosen automatically from the VMEM budget.
    """
    N, in_f = x.shape
    out_f = weight.shape[1]

    in_p = _round_up(in_f, 128)
    out_p = _round_up(out_f, 128)
    # Reassociation: run the O(N^2 * F) aggregation over the smaller padded width.
    aggregate_first = in_p < out_p          # (adj @ x) @ W  vs  adj @ (x @ W)

    # Node-dim padding and tiles: pad to a multiple of 256 so tiles never fall
    # back to 128; tk up to 1024 (fewer output RMW rounds), tm up to 512.
    n_pad = _round_up(max(N, 256), 256)
    tk = _largest_divisor(n_pad, (1024, 512, 256))
    tm = _largest_divisor(n_pad, (512, 256))
    if n_pad // tm < 2:
        tm //= 2                            # >= 2 row tiles for v7x's 2 TensorCores

    vmem_limit = _vmem_limit_bytes()
    cd_bytes = jnp.dtype(compute_dtype).itemsize
    approx_recip = jnp.dtype(compute_dtype) != jnp.dtype(jnp.float32)

    f_cols = in_p if aggregate_first else out_p
    if support_resident is None:
        resident_bytes = (2 * tm * tk * cd_bytes            # adj tiles (2 buffers)
                          + 2 * tm * f_cols * 4             # out tiles (f32)
                          + 2 * n_pad * f_cols * cd_bytes)  # resident features
        support_resident = resident_bytes <= int(vmem_limit * 0.7)

    f32 = jnp.float32
    adj_p = _pad_2d(adj.astype(f32), n_pad, n_pad).astype(compute_dtype)
    w_p = _pad_2d(weight.astype(f32), in_p, out_p)
    b_real = (jnp.zeros((1, out_p), f32) if bias is None
              else _pad_2d(bias.astype(f32), 1, out_p))

    if not aggregate_first:
        # Stage 1: support = x @ W (ones column folded into a spare padded lane).
        rowsum_col = out_f if (should_normalize and out_f % 128 != 0) else None
        x_p = _pad_2d(x.astype(f32), n_pad, in_p)
        b_zero = jnp.zeros((1, out_p), f32)
        support = _dense(x_p, w_p, b_zero, compute_dtype, tm, vmem_limit,
                         ones_col=rowsum_col)
        # Stage 2: out = rownorm(adj) @ support + bias   (deferred normalization).
        out_padded = _aggregate(adj_p, support, b_real, tm, tk, should_normalize,
                                rowsum_col, support_resident, approx_recip,
                                vmem_limit)
    else:
        # Stage 1: h = rownorm(adj) @ x   (ones column in x's spare padded lane).
        rowsum_col = in_f if (should_normalize and in_f % 128 != 0) else None
        x_cd = _pad_2d(x.astype(f32), n_pad, in_p).astype(compute_dtype)
        if rowsum_col is not None:
            x_cd = x_cd.at[:, rowsum_col].set(1.0)
        b_zero_in = jnp.zeros((1, in_p), f32)
        h = _aggregate(adj_p, x_cd, b_zero_in, tm, tk, should_normalize,
                       rowsum_col, support_resident, approx_recip, vmem_limit)
        # Stage 2: out = h @ W + bias.
        out_padded = _dense(h, w_p, b_real, f32, tm, vmem_limit, ones_col=None)

    return out_padded[:N, :out_f]


# --------------------------------------------------------------------------- #
# Self-test
# --------------------------------------------------------------------------- #
if __name__ == "__main__":
    def reference(x, weight, adj, bias, should_normalize=True):
        support = x @ weight
        if should_normalize:
            rowsum = adj.sum(axis=1, keepdims=True)
            r_inv = jnp.where(rowsum == 0.0, 0.0, 1.0 / rowsum)
            adj = adj * r_inv
        out = adj @ support
        return out if bias is None else out + bias

    N, in_features = 16, 32
    key = jax.random.PRNGKey(0)
    kx, kadj, kw1, kb1, kw2, kb2 = jax.random.split(key, 6)

    x = jax.random.normal(kx, (N, in_features), jnp.float32)
    adj_dense = jax.random.uniform(kadj, (N, N), jnp.float32)
    adj = jnp.where(adj_dense > 0.7, adj_dense, 0.0)   # sparse-ish dense adjacency

    def make_params(kw, kb, out_features):
        # reset_parameters(): uniform(-stdv, stdv), stdv = 1/sqrt(out_features)
        stdv = 1.0 / math.sqrt(out_features)
        w = jax.random.uniform(kw, (in_features, out_features), jnp.float32,
                               minval=-stdv, maxval=stdv)
        b = jax.random.uniform(kb, (1, out_features), jnp.float32,
                               minval=-stdv, maxval=stdv)
        return w, b

    def check(out, ref, shape, atol, rtol, name):
        out = jax.block_until_ready(out)
        assert out.shape == shape, (name, out.shape, shape)
        err = float(jnp.max(jnp.abs(out - ref)))
        assert jnp.allclose(out, ref, atol=atol, rtol=rtol), (name, err)

    w64, b64 = make_params(kw1, kb1, 64)      # padded in == out -> adj @ (x @ W)
    w200, b200 = make_params(kw2, kb2, 200)   # padded in < out  -> (adj @ x) @ W
    w128, b128 = make_params(kw1, kb1, 128)   # out % 128 == 0 -> scratch rowsum

    # A: f32, classic order, MXU-folded rowsum, resident support (strict check).
    out_a = graph_convolution(x, w64, adj, b64)
    check(out_a, reference(x, w64, adj, b64), (N, 64), 1e-5, 1e-5, "A")

    # B: f32, reassociated order (adj @ x) @ W.
    out_b = graph_convolution(x, w200, adj, b200)
    check(out_b, reference(x, w200, adj, b200), (N, 200), 1e-5, 1e-5, "B")

    # C: bf16 aggregation matmul (fast path), loose tolerance.
    out_c = graph_convolution(x, w64, adj, b64, compute_dtype=jnp.bfloat16)
    check(out_c, reference(x, w64, adj, b64), (N, 64), 5e-2, 5e-2, "C")

    # D: no normalization, no bias, forced k-tiled (non-resident) feature path.
    out_d = graph_convolution(x, w64, adj, None, should_normalize=False,
                              support_resident=False)
    check(out_d, reference(x, w64, adj, None, False), (N, 64), 1e-5, 1e-5, "D")

    # E: out_features an exact multiple of 128 -> scratch-rowsum fallback path.
    out_e = graph_convolution(x, w128, adj, b128)
    check(out_e, reference(x, w128, adj, b128), (N, 128), 1e-5, 1e-5, "E")

    print("KERNEL_OK")
</pallas_src>

<mosaic_0001>
module attributes {stable_mosaic.version = 11 : i64} {
  func.func @kernel(%arg0: i32, %arg1: memref<128x128xf32, #tpu.memory_space<vmem>>, %arg2: memref<128x128xf32, #tpu.memory_space<vmem>>, %arg3: memref<1x128xf32, #tpu.memory_space<vmem>>, %arg4: memref<128x128xf32, #tpu.memory_space<vmem>>) attributes {dimension_semantics = [#tpu.dimension_semantics<parallel>], iteration_bounds = array<i64: 2>, scalar_prefetch = 0 : i64, scratch_operands = 0 : i64, tpu.core_type = #tpu.core_type<tc>, window_params = [{transform_indices = @transform_0, window_bounds = array<i64: 128, 128>}, {pipeline_mode = #tpu.pipeline_mode<synchronous>, transform_indices = @transform_1, window_bounds = array<i64: 128, 128>}, {pipeline_mode = #tpu.pipeline_mode<synchronous>, transform_indices = @transform_2, window_bounds = array<i64: 1, 128>}, {transform_indices = @transform_3, window_bounds = array<i64: 128, 128>}]} {
    %c0 = arith.constant 0 : index
    %c0_0 = arith.constant 0 : index
    %0 = vector.load %arg1[%c0, %c0_0] : memref<128x128xf32, #tpu.memory_space<vmem>>, vector<128x128xf32>
    %c0_1 = arith.constant 0 : index
    %c0_2 = arith.constant 0 : index
    %1 = vector.load %arg2[%c0_1, %c0_2] : memref<128x128xf32, #tpu.memory_space<vmem>>, vector<128x128xf32>
    %cst = arith.constant dense<0.000000e+00> : vector<128x128xf32>
    %2 = tpu.matmul %0, %1, %cst {dimension_numbers = #tpu.dot_dimension_numbers<[1], [0], [0], [1], [0, 0, 1, 1], [], []>} : vector<128x128xf32>, vector<128x128xf32>, vector<128x128xf32> -> vector<128x128xf32>
    %c0_3 = arith.constant 0 : index
    %c0_4 = arith.constant 0 : index
    %3 = vector.load %arg3[%c0_3, %c0_4] : memref<1x128xf32, #tpu.memory_space<vmem>>, vector<1x128xf32>
    %4 = vector.broadcast %3 : vector<1x128xf32> to vector<128x128xf32>
    %5 = arith.addf %2, %4 : vector<128x128xf32>
    %6 = tpu.iota {dimensions = array<i32: 1>} : vector<128x128xi32>
    %c64_i32 = arith.constant 64 : i32
    %7 = vector.broadcast %c64_i32 : i32 to vector<128x128xi32>
    %8 = arith.cmpi eq, %6, %7 : vector<128x128xi32>
    %cst_5 = arith.constant 1.000000e+00 : f32
    %9 = vector.broadcast %cst_5 : f32 to vector<128x128xf32>
    %10 = arith.select %8, %9, %5 : vector<128x128xi1>, vector<128x128xf32>
    %c0_6 = arith.constant 0 : index
    %c0_7 = arith.constant 0 : index
    %11 = vector.load %arg4[%c0_6, %c0_7] : memref<128x128xf32, #tpu.memory_space<vmem>>, vector<128x128xf32>
    tpu.vector_store %arg4[%c0_6, %c0_7], %10 {strides = array<i32>} : memref<128x128xf32, #tpu.memory_space<vmem>>, vector<128x128xf32>,
    return
  }
  func.func @transform_0(%arg0: i32) -> (i32, i32) {
    %c0_i32 = arith.constant 0 : i32
    %c0_i32_0 = arith.constant 0 : i32
    return %arg0, %c0_i32 : i32, i32
  }
  func.func @transform_1(%arg0: i32) -> (i32, i32) {
    %c0_i32 = arith.constant 0 : i32
    %c0_i32_0 = arith.constant 0 : i32
    %c0_i32_1 = arith.constant 0 : i32
    return %c0_i32, %c0_i32_0 : i32, i32
  }
  func.func @transform_2(%arg0: i32) -> (i32, i32) {
    %c0_i32 = arith.constant 0 : i32
    %c0_i32_0 = arith.constant 0 : i32
    %c0_i32_1 = arith.constant 0 : i32
    return %c0_i32, %c0_i32_0 : i32, i32
  }
  func.func @transform_3(%arg0: i32) -> (i32, i32) {
    %c0_i32 = arith.constant 0 : i32
    %c0_i32_0 = arith.constant 0 : i32
    return %arg0, %c0_i32 : i32, i32
  }
}

</mosaic_0001>

<bundles_post_ra>
// kernel: tpu_custom_call.1
= control target key start
LH: loop header
LB: loop body
LE: loop exit
PB: predicated region body
PF: predicated region fallthrough
CT: control target
= control target key end

     0   :  { %8 = vsyncpa [#allocation3], 0  ;;  %s1181_s0 = inlined_call_operand.hbm [shape: f32[256,128], index: 0, kind: input, shape index: {}]   ;;  %s1182_s1 = inlined_call_operand.hbm [shape: f32[128,128], index: 1, kind: input, shape index: {}]   ;;  %s1183_s2 = inlined_call_operand.vmem [shape: f32[1,128], index: 2, kind: input, shape index: {}]   ;;  %s1184_s3 = inlined_call_operand.hbm [shape: f32[256,128], index: 3, kind: output, shape index: {}]  }
   0x1   :  { %10 = vsyncpa [#allocation3 + $0x1], 0 }
   0x2   :  { %11 = vsyncpa [#allocation6], 0 }
   0x3   :  { %12 = vsyncpa [#allocation4], 0 }
   0x4   :  { %14 = vsyncpa [#allocation4 + $0x1], 0  ;;  %s895_s12 = smov 0   ;;  %s897_s13 = smov 0  }
   0x5   :  { %s899_s14 = smov 0   ;;  %s901_s15 = smov 0  }
   0x6 LB: > { %s916_s16 = sadd.s32 4294967295, %s866_s15   ;;  %s522_s17 = sadd.s32 4294967294, %s866_s15   ;;  %s866_s15 = sphi %s901_s15, %s1204_s15   ;;  %s862_s14 = sphi %s899_s14, %s1203_s14   ;;  %s858_s13 = sphi %s897_s13, %s1202_s13   ;;  %s854_s12 = sphi %s895_s12, %s1201_s12  }
   0x7   : > { %p40_p0 = scmp.ne.s32.totalorder %s858_s13, %s854_s12  ;;  %p1185_p1 = scmp.eq.s32.totalorder %s916_s16, 0 }
   0x8   : > { %p112_p3 = scmp.eq.s32.totalorder %s522_s17, 1  ;;  %p523_p5 = scmp.ge.s32.totalorder %s866_s15, 1 }
   0x9   : > { %p925_p4 = por %p1185_p1, %p40_p0  ;;  %p119_p7 = scmp.lt.s32.totalorder %s866_s15, 3 }
   0xa   : > { %p930_p6 = por %p112_p3, %p40_p0  ;;  %s868_s21 = smov [#allocation5]  }
   0xb   : > { %s1188_s18 = scalar_select %p925_p4, 1, 0 }
   0xc   : > { %s1189_s19 = scalar_select %p930_p6, 1, 0 }
   0xd   : > { %p935_p8 = pnand %p523_p5, %p119_p7  ;;  %s131_s22 = sshll.u32 %s868_s21, 4  ;;  %s939_s22 = int_to_ptr.vmem [resolvable:$true] %s131_s22 }
   0xe   : > { %s951_s24 = sadd.s32 1, %s866_s15   ;;  %s27_s25 = sadd.s32 1, %s862_s14 }
   0xf   : > { %s1190_s20 = scalar_select %p935_p8, 1, 0 }
  0x10   : > { %p685_p9 = pneg %p935_p8  ;;  %s24_s26 = ssub.s32 %s866_s15, %s951_s24 }
  0x11   : > { %s738_s29 = scalar_lea.hbm %s1182_s1, 2048 }
  0x12   : > { %p946_p11 = pnand %p685_p9, %p1185_p1  ;;  %p739_p12 = scmp.ne.s32.totalorder %s1182_s1, %s738_s29 }
  0x13   : > { %p745_p5 = scmp.lt.u32.totalorder %s738_s29, %s1182_s1 }
  0x14   : > { %p740_p13 = pneg %p946_p11 }
  0x16   : > { %p741_p0 = pnand %p740_p13, %p739_p12 }
  0x18   : > { %p742_p3 = pneg %p741_p0 }
  0x1a   : > { %p747_p7 = pnand %p745_p5, %p742_p3 }
  0x1c   : > { %750 = shalt.err (!%p747_p7)
}
  0x1d   : > { %s751_s7 = scalar_lea.vmem %s939_s22, 2048  ;;  %p759_p2 = scmp.lt.s32.totalorder %s939_s22, %s939_s22 }
  0x1e   : > { %p752_p9 = scmp.ne.s32.totalorder %s939_s22, %s751_s7  ;;  %p760_p6 = scmp.lt.s32.totalorder %s751_s7, %s751_s7 }
  0x20   : > { %p754_p10 = pnand %p752_p9, %p740_p13  ;;  %p761_p4 = por %p760_p6, %p759_p2 }
  0x22   : > { %p755_p1 = pneg %p754_p10 }
  0x24   : > { %p762_p8 = pnand %p761_p4, %p755_p1 }
  0x26   : > { %765 = shalt.err (!%p762_p8)
}
  0x27   : > { %s869_s8 = smov 128   ;;  %s870_s9 = smov 8  }
  0x28   : > { %688 = dma.hbm_to_vmem [thread:$0]  (!%p946_p11), %s1182_s1, 2048, %s939_s22, [#allocation6], %s869_s8, %s869_s8, %s870_s9  }
  0x29   : > { %p25_p1 = scmp.eq.s32.totalorder %s24_s26, 0  ;;  %p34_p2 = scmp.ne.s32.totalorder %s862_s14, %s858_s13 }
  0x2a   : > { %p35_p4 = scmp.eq.s32.totalorder %s866_s15, 0  ;;  %p698_p6 = scmp.lt.s32.totalorder %s866_s15, 2 }
  0x2b   : > { %s985_s17 = scalar_select %p25_p1, %s862_s14, %s27_s25  }
  0x2c   : > { %p36_p8 = por %p35_p4, %p34_p2  ;;  %p1192_p10 = scmp.eq.s32.totalorder %s916_s16, 1 }
  0x2d   : > { %s148_s23 = sand.u32 1, %s862_s14   ;;  %s539_s27 = sshll.u32 %s866_s15, 11 }
  0x2e   : > { %p989_p12 = por %p1192_p10, %p34_p2  ;;  %s526_s28 = sshll.u32 %s148_s23, 7 }
  0x2f   : > { %s998_s4 = scalar_lea.hbm %s1181_s0, %s539_s27  ;;  %s152_s22 = scalar_lea.vmem [#allocation2], %s526_s28 }
  0x30   : > { %s159_s25 = sshll.u32 %s152_s22, 4  ;;  %p1000_p11 = pnand %p698_p6, %p36_p8  ;;  %s1004_s25 = int_to_ptr.vmem [resolvable:$true] %s159_s25 }
  0x31   : > { %s1006_s5 = scalar_lea.sflag [#allocation3], %s148_s23  ;;  %s766_s6 = scalar_lea.hbm %s998_s4, 2048 }
  0x32   : > { %p767_p13 = scmp.ne.s32.totalorder %s998_s4, %s766_s6  ;;  %p768_p0 = pneg %p1000_p11 }
  0x33   : > { %s771_s11 = scalar_lea.hbm %s1181_s0, 4096  ;;  %p772_p7 = scmp.lt.u32.totalorder %s998_s4, %s1181_s0 }
  0x34   : > { %p769_p3 = pnand %p768_p0, %p767_p13  ;;  %p773_p9 = scmp.lt.u32.totalorder %s771_s11, %s766_s6 }
  0x35   : > { %p775_p2 = scmp.lt.u32.totalorder %s766_s6, %s998_s4 }
  0x36   : > { %p770_p5 = pneg %p769_p3  ;;  %p774_p1 = por %p773_p9, %p772_p7 }
  0x38   : > { %p776_p4 = por %p775_p2, %p774_p1 }
  0x3a   : > { %p777_p6 = pnand %p776_p4, %p770_p5 }
  0x3c   : > { %780 = shalt.err (!%p777_p6)
}
  0x3d   : > { %s781_s23 = scalar_lea.vmem %s1004_s25, 2048  ;;  %s871_s29 = smov [#allocation2]  }
  0x3e   : > { %p782_p8 = scmp.ne.s32.totalorder %s1004_s25, %s781_s23  ;;  %s786_s30 = sshll.u32 %s871_s29, 4  ;;  %s787_s30 = int_to_ptr.vmem [resolvable:$false] %s786_s30 }
  0x3f   : > { %s788_s22 = scalar_lea.vmem %s787_s30, 4096  ;;  %p789_p3 = scmp.lt.s32.totalorder %s1004_s25, %s787_s30 }
  0x40   : > { %p784_p10 = pnand %p782_p8, %p768_p0  ;;  %p790_p7 = scmp.lt.s32.totalorder %s788_s22, %s781_s23 }
  0x42   : > { %p785_p13 = pneg %p784_p10  ;;  %p791_p9 = por %p790_p7, %p789_p3 }
  0x44   : > { %p792_p1 = pnand %p791_p9, %p785_p13 }
  0x46   : > { %795 = shalt.err (!%p792_p1)
}
  0x47   : > { %692 = dma.hbm_to_vmem [thread:$0]  (!%p1000_p11), %s998_s4, 2048, %s1004_s25, %s1006_s5, %s869_s8, %s869_s8, %s870_s9  }
  0x48   : > { %p1195_p0 = scmp.ne.s32.totalorder %s1190_s20, 0 }
  0x49   : > { %s1040_s6 = sand.u32 (!%p1195_p0), 1, %s858_s13   ;;  %p1196_p5 = scmp.ne.s32.totalorder (!%p1195_p0), %s1188_s18, 0 }
  0x4a   : > { %171 = sbr.rel (%p1195_p0) target bundleno = 363 (0x16b), region = 32  ;;  %s530_s7 = sshll.u32 (!%p1195_p0), %s1040_s6, 7 }
  0x4b   : > { %s174_s10 = scalar_lea.sflag (!%p1195_p0), [#allocation3], %s1040_s6  ;;  %s1046_s26 = scalar_lea.vmem (!%p1195_p0), [#allocation2], %s530_s7 }
  0x51   : > { %841 = dma.done.wait (%p1196_p5), %s174_s10, 2048  }
  0x52   : > { %843 = vsyncadd (%p1196_p5), %s174_s10, 4294965248  ;;  %p1197_p11 = scmp.eq.s32.totalorder %s916_s16, 0 }
  0x54   : > { %845 = dma.done.wait (%p1197_p11), [#allocation6], 2048   ;;  %p1198_p2 = pmov %p1197_p11 }
  0x55   : > { %v222_v0 = vld [vmem:[#allocation5] sm:$0xff]  ;;  %v223_v1 = vld [vmem:[#allocation5 + $0x8] sm:$0xff]  ;;  %v224_v2 = vld [vmem:[#allocation5 + $0x10] sm:$0xff]  ;;  %v390_v40 = vlaneseq  ;;  %s1084_s8 = scalar_lea.vmem [#allocation7], %s530_s7  ;;  %s540_s9 = sshll.u32 %s916_s16, 11 }
  0x56   : > { %847 = vsyncadd (%p1198_p2), [#allocation6], 4294965248  ;;  %v629_v3 = vpack.c.bf16 %v223_v1, %v222_v0  ;;  %v225_v4 = vld [vmem:[#allocation5 + $0x18] sm:$0xff]  ;;  %v226_v6 = vld [vmem:[#allocation5 + $0x20] sm:$0xff]  ;;  %s439_s4 = sshll.u32 %s1084_s8, 4  ;;  %s1123_s5 = scalar_lea.hbm %s1184_s3, %s540_s9  ;;  %s1125_s4 = int_to_ptr.vmem [resolvable:$true] %s439_s4 }
  0x57   : > { %v633_v5 = vpack.c.bf16 %v225_v4, %v224_v2  ;;  %v227_v7 = vld [vmem:[#allocation5 + $0x28] sm:$0xff]  ;;  %v206_v9 = vld [vmem:[%s1046_s26] sm:$0xff]  ;;  %v228_v11 = vld [vmem:[#allocation5 + $0x30] sm:$0xff]  ;;  %v1072_v41 = vand.u32 127, %v390_v40  ;;  %s426_s11 = scalar_lea.sflag [#allocation4], %s1040_s6  ;;  %s796_s27 = scalar_lea.vmem %s1125_s4, 2048 }
  0x58   : > { %630 = vmatprep.subr.bf16.mxu0 %v629_v3  ;;  %661 = vmatprep.subr.bf16.mxu1 %v629_v3  ;;  %v637_v8 = vpack.c.bf16 %v227_v7, %v226_v6  ;;  %v214_v10 = vld [vmem:[%s1046_s26 + $0x40] sm:$0xff]  ;;  %v229_v12 = vld [vmem:[#allocation5 + $0x38] sm:$0xff]  ;;  %v231_v15 = vld [vmem:[#allocation5 + $0x48] sm:$0xff]  ;;  %p797_p4 = scmp.ne.s32.totalorder %s1125_s4, %s796_s27  ;;  %s872_s28 = smov [#allocation7]  }
  0x59   : > { %632 = vmatpush3.bf16.msra.mxu0 %v629_v3  ;;  %669 = vmatpush3.bf16.msra.mxu1 %v629_v3  ;;  %v641_v13 = vpack.c.bf16 %v229_v12, %v228_v11  ;;  %v230_v14 = vld [vmem:[#allocation5 + $0x40] sm:$0xff]  ;;  %v232_v17 = vld [vmem:[#allocation5 + $0x50] sm:$0xff]  ;;  %v233_v18 = vld [vmem:[#allocation5 + $0x58] sm:$0xff]  ;;  %vm392_vm0 = vcmp.eq.s32.totalorder %v1072_v41, 64  ;;  %s800_s23 = sshll.u32 %s872_s28, 4  ;;  %s801_s23 = int_to_ptr.vmem [resolvable:$false] %s800_s23 }
  0x5a   : > { %634 = vmatprep.subr.bf16.mxu0 %v633_v5  ;;  %662 = vmatprep.subr.bf16.mxu1 %v633_v5  ;;  %v645_v16 = vpack.c.bf16 %v231_v15, %v230_v14  ;;  %v649_v19 = vpack.c.bf16 %v233_v18, %v232_v17  ;;  %v234_v20 = vld [vmem:[#allocation5 + $0x60] sm:$0xff]  ;;  %v235_v21 = vld [vmem:[#allocation5 + $0x68] sm:$0xff]  ;;  %v236_v23 = vld [vmem:[#allocation5 + $0x70] sm:$0xff]  ;;  %p798_p6 = pnand %p797_p4, %p989_p12  ;;  %s802_s29 = scalar_lea.vmem %s801_s23, 4096 }
  0x5b   : > { %605 = vmatprep.mubr.f32.mxu0 %v206_v9  ;;  %617 = vmatprep.mubr.f32.mxu1 %v214_v10  ;;  %v653_v22 = vpack.c.bf16 %v235_v21, %v234_v20  ;;  %v237_v24 = vld [vmem:[#allocation5 + $0x78] sm:$0xff]  ;;  %v207_v26 = vld [vmem:[%s1046_s26 + $0x8] sm:$0xff]  ;;  %v208_v28 = vld [vmem:[%s1046_s26 + $0x10] sm:$0xff]  ;;  %p803_p10 = scmp.lt.s32.totalorder %s1125_s4, %s801_s23  ;;  %p804_p13 = scmp.lt.s32.totalorder %s802_s29, %s796_s27 }
  0x5c   : > { %v657_v25 = vpack.c.bf16 %v237_v24, %v236_v23  ;;  %v215_v27 = vld [vmem:[%s1046_s26 + $0x48] sm:$0xff]  ;;  %v216_v29 = vld [vmem:[%s1046_s26 + $0x50] sm:$0xff]  ;;  %v209_v30 = vld [vmem:[%s1046_s26 + $0x18] sm:$0xff]  ;;  %p799_p8 = pneg %p798_p6 }
  0x5d   : > { %636 = vmatpush3.bf16.msra.mxu0 %v633_v5  ;;  %670 = vmatpush3.bf16.msra.mxu1 %v633_v5  ;;  %v217_v31 = vld [vmem:[%s1046_s26 + $0x58] sm:$0xff]  ;;  %v210_v32 = vld [vmem:[%s1046_s26 + $0x20] sm:$0xff]  ;;  %v211_v34 = vld [vmem:[%s1046_s26 + $0x28] sm:$0xff]  ;;  %p805_p3 = por %p804_p13, %p803_p10 }
  0x5e   : > { %638 = vmatprep.subr.bf16.mxu0 %v637_v8  ;;  %663 = vmatprep.subr.bf16.mxu1 %v637_v8  ;;  %v218_v33 = vld [vmem:[%s1046_s26 + $0x60] sm:$0xff]  ;;  %v219_v35 = vld [vmem:[%s1046_s26 + $0x68] sm:$0xff]  ;;  %v212_v36 = vld [vmem:[%s1046_s26 + $0x30] sm:$0xff] }
  0x5f   : > { %v220_v37 = vld [vmem:[%s1046_s26 + $0x70] sm:$0xff]  ;;  %v213_v38 = vld [vmem:[%s1046_s26 + $0x38] sm:$0xff]  ;;  %v533_v42 = vld [vmem:[%s1183_s2] ss:$0 sm:$0xff]  ;;  %p806_p7 = pnand %p805_p3, %p799_p8 }
  0x60   : > { %v221_v39 = vld [vmem:[%s1046_s26 + $0x78] sm:$0xff] }
  0x61   : > { %640 = vmatpush3.bf16.msra.mxu0 %v637_v8  ;;  %671 = vmatpush3.bf16.msra.mxu1 %v637_v8 }
  0x62   : > { %642 = vmatprep.subr.bf16.mxu0 %v641_v13  ;;  %664 = vmatprep.subr.bf16.mxu1 %v641_v13 }
  0x65   : > { %644 = vmatpush3.bf16.msra.mxu0 %v641_v13  ;;  %672 = vmatpush3.bf16.msra.mxu1 %v641_v13 }
  0x66   : > { %646 = vmatprep.subr.bf16.mxu0 %v645_v16  ;;  %665 = vmatprep.subr.bf16.mxu1 %v645_v16 }
  0x69   : > { %648 = vmatpush3.bf16.msra.mxu0 %v645_v16  ;;  %673 = vmatpush3.bf16.msra.mxu1 %v645_v16 }
  0x6a   : > { %650 = vmatprep.subr.bf16.mxu0 %v649_v19  ;;  %666 = vmatprep.subr.bf16.mxu1 %v649_v19 }
  0x6d   : > { %652 = vmatpush3.bf16.msra.mxu0 %v649_v19  ;;  %674 = vmatpush3.bf16.msra.mxu1 %v649_v19 }
  0x6e   : > { %654 = vmatprep.subr.bf16.mxu0 %v653_v22  ;;  %667 = vmatprep.subr.bf16.mxu1 %v653_v22 }
  0x71   : > { %656 = vmatpush3.bf16.msra.mxu0 %v653_v22  ;;  %675 = vmatpush3.bf16.msra.mxu1 %v653_v22 }
  0x72   : > { %658 = vmatprep.subr.bf16.mxu0 %v657_v25  ;;  %668 = vmatprep.subr.bf16.mxu1 %v657_v25 }
  0x75   : > { %660 = vmatpush3.bf16.msra.mxu0 %v657_v25  ;;  %676 = vmatpush3.bf16.msra.mxu1 %v657_v25 }
  0x78   : > { %606 = vmatmul.mubr.f32.vlgmr.msra.gmra.mrb[0].mxu0 %v207_v26  ;;  %618 = vmatmul.mubr.f32.vlgmr.msra.gmra.mrb[0].mxu1 %v215_v27 }
  0x79   : > { %608 = vmatprep.mubr.f32.mxu0 %v208_v28  ;;  %620 = vmatprep.mubr.f32.mxu1 %v216_v29 }
  0x7c   : > { %609 = vmatmul.mubr.f32.gmra.mrb[2].mxu0 %v209_v30  ;;  %621 = vmatmul.mubr.f32.gmra.mrb[2].mxu1 %v217_v31 }
  0x7d   : > { %611 = vmatprep.mubr.f32.mxu0 %v210_v32  ;;  %623 = vmatprep.mubr.f32.mxu1 %v218_v33 }
  0x80   : > { %612 = vmatmul.mubr.f32.gmra.mrb[4].mxu0 %v211_v34  ;;  %624 = vmatmul.mubr.f32.gmra.mrb[4].mxu1 %v219_v35 }
  0x81   : > { %614 = vmatprep.mubr.f32.mxu0 %v212_v36  ;;  %626 = vmatprep.mubr.f32.mxu1 %v220_v37 }
  0x84   : > { %615 = vmatmul.mubr.f32.gmra.mrb[6].mxu0 %v213_v38  ;;  %627 = vmatmul.mubr.f32.gmra.mrb[6].mxu1 %v221_v39 }
 0x14b   : > { %v607_v43 = vpop.f32.mrb[0].mxu0  ;;  %v619_v44 = vpop.f32.mrb[0].mxu1 }
 0x14c   : > { %v317_v45 = vadd.f32 %v607_v43, %v533_v42  ;;  %v357_v46 = vadd.f32 %v619_v44, %v533_v42  ;;  %v311_v47 = vpop.f32.mrb[1].mxu0  ;;  %v351_v48 = vpop.f32.mrb[1].mxu1 }
 0x14d   : > { %v312_v49 = vadd.f32 %v533_v42, %v311_v47  ;;  %v352_v50 = vadd.f32 %v533_v42, %v351_v48 }
 0x14e   : > { %v394_v51 = vsel %vm392_vm0, 1.0, %v317_v45  ;;  %v402_v52 = vsel %vm392_vm0, 1.0, %v357_v46 }
 0x14f   : > { %410 = vst [vmem:[%s1084_s8 + $0x8] sm:$0xff] %v394_v51  ;;  %418 = vst [vmem:[%s1084_s8 + $0x48] sm:$0xff] %v402_v52  ;;  %v393_v53 = vsel %vm392_vm0, 1.0, %v312_v49  ;;  %v401_v54 = vsel %vm392_vm0, 1.0, %v352_v50  ;;  %v610_v55 = vpop.f32.mrb[2].mxu0  ;;  %v622_v56 = vpop.f32.mrb[2].mxu1 }
 0x150   : > { %409 = vst [vmem:[%s1084_s8] sm:$0xff] %v393_v53  ;;  %417 = vst [vmem:[%s1084_s8 + $0x40] sm:$0xff] %v401_v54  ;;  %v327_v57 = vadd.f32 %v610_v55, %v533_v42  ;;  %v367_v58 = vadd.f32 %v622_v56, %v533_v42  ;;  %v321_v59 = vpop.f32.mrb[3].mxu0  ;;  %v361_v60 = vpop.f32.mrb[3].mxu1 }
 0x151   : > { %v322_v61 = vadd.f32 %v533_v42, %v321_v59  ;;  %v362_v62 = vadd.f32 %v533_v42, %v361_v60 }
 0x152   : > { %v396_v63 = vsel %vm392_vm0, 1.0, %v327_v57  ;;  %v404_v0 = vsel %vm392_vm0, 1.0, %v367_v58 }
 0x153   : > { %412 = vst [vmem:[%s1084_s8 + $0x18] sm:$0xff] %v396_v63  ;;  %420 = vst [vmem:[%s1084_s8 + $0x58] sm:$0xff] %v404_v0  ;;  %v395_v1 = vsel %vm392_vm0, 1.0, %v322_v61  ;;  %v403_v2 = vsel %vm392_vm0, 1.0, %v362_v62  ;;  %v613_v3 = vpop.f32.mrb[4].mxu0  ;;  %v625_v4 = vpop.f32.mrb[4].mxu1 }
 0x154   : > { %411 = vst [vmem:[%s1084_s8 + $0x10] sm:$0xff] %v395_v1  ;;  %419 = vst [vmem:[%s1084_s8 + $0x50] sm:$0xff] %v403_v2  ;;  %v337_v5 = vadd.f32 %v613_v3, %v533_v42  ;;  %v377_v6 = vadd.f32 %v625_v4, %v533_v42  ;;  %v331_v7 = vpop.f32.mrb[5].mxu0  ;;  %v371_v8 = vpop.f32.mrb[5].mxu1 }
 0x155   : > { %v332_v9 = vadd.f32 %v533_v42, %v331_v7  ;;  %v372_v10 = vadd.f32 %v533_v42, %v371_v8 }
 0x156   : > { %v398_v11 = vsel %vm392_vm0, 1.0, %v337_v5  ;;  %v406_v12 = vsel %vm392_vm0, 1.0, %v377_v6 }
 0x157   : > { %414 = vst [vmem:[%s1084_s8 + $0x28] sm:$0xff] %v398_v11  ;;  %422 = vst [vmem:[%s1084_s8 + $0x68] sm:$0xff] %v406_v12  ;;  %v397_v13 = vsel %vm392_vm0, 1.0, %v332_v9  ;;  %v405_v14 = vsel %vm392_vm0, 1.0, %v372_v10  ;;  %v616_v15 = vpop.f32.mrb[6].mxu0  ;;  %v628_v16 = vpop.f32.mrb[6].mxu1 }
 0x158   : > { %413 = vst [vmem:[%s1084_s8 + $0x20] sm:$0xff] %v397_v13  ;;  %421 = vst [vmem:[%s1084_s8 + $0x60] sm:$0xff] %v405_v14  ;;  %v347_v17 = vadd.f32 %v616_v15, %v533_v42  ;;  %v387_v18 = vadd.f32 %v628_v16, %v533_v42  ;;  %v341_v19 = vpop.f32.mrb[7].mxu0  ;;  %v381_v20 = vpop.f32.mrb[7].mxu1 }
 0x159   : > { %v342_v21 = vadd.f32 %v533_v42, %v341_v19  ;;  %v382_v22 = vadd.f32 %v533_v42, %v381_v20 }
 0x15a   : > { %v400_v23 = vsel %vm392_vm0, 1.0, %v347_v17  ;;  %v408_v24 = vsel %vm392_vm0, 1.0, %v387_v18 }
 0x15b   : > { %416 = vst [vmem:[%s1084_s8 + $0x38] sm:$0xff] %v400_v23  ;;  %424 = vst [vmem:[%s1084_s8 + $0x78] sm:$0xff] %v408_v24  ;;  %v399_v25 = vsel %vm392_vm0, 1.0, %v342_v21  ;;  %v407_v26 = vsel %vm392_vm0, 1.0, %v382_v22 }
 0x15c   : > { %415 = vst [vmem:[%s1084_s8 + $0x30] sm:$0xff] %v399_v25  ;;  %423 = vst [vmem:[%s1084_s8 + $0x70] sm:$0xff] %v407_v26 }
 0x15d   : > { %809 = shalt.err (!%p806_p7)
}
 0x15e   : > { %s810_s30 = scalar_lea.hbm %s1123_s5, 2048  ;;  %s814_s10 = scalar_lea.hbm %s1184_s3, 4096 }
 0x15f   : > { %p811_p9 = scmp.ne.s32.totalorder %s1123_s5, %s810_s30  ;;  %p815_p5 = scmp.lt.u32.totalorder %s1123_s5, %s1184_s3 }
 0x160   : > { %p816_p11 = scmp.lt.u32.totalorder %s814_s10, %s810_s30  ;;  %p818_p4 = scmp.lt.u32.totalorder %s810_s30, %s1123_s5 }
 0x161   : > { %p812_p1 = pnand %p811_p9, %p989_p12 }
 0x162   : > { %p817_p2 = por %p816_p11, %p815_p5 }
 0x163   : > { %p813_p0 = pneg %p812_p1 }
 0x164   : > { %p819_p6 = por %p818_p4, %p817_p2 }
 0x166   : > { %p820_p8 = pnand %p819_p6, %p813_p0 }
 0x168   : > { %823 = shalt.err (!%p820_p8)
}
 0x169   : > { %s873_s20 = smov 128   ;;  %s874_s8 = smov 8  }
 0x16a   : > { %683 = dma.vmem_to_hbm [thread:$0]  (%p989_p12), %s1125_s4, 2048, %s1123_s5, %s426_s11, %s873_s20, %s873_s20, %s874_s8  }
 0x16b PF: > { %s454_s9 = sand.u32 1, %s854_s12   ;;  %p1199_p10 = scmp.ne.s32.totalorder %s1189_s19, 0 }
 0x16c   : > { %p1200_p13 = scmp.ge.s32.totalorder %s866_s15, 2  ;;  %s455_s16 = scalar_lea.sflag [#allocation4], %s454_s9 }
 0x16e   : > { %p694_p3 = pnand %p1200_p13, %p1199_p10 }
 0x170   : > { %849 = dma.done.wait (!%p694_p3), %s455_s16, 2048  }
 0x171   : > { %851 = vsyncadd (!%p694_p3), %s455_s16, 4294965248  ;;  %p17_p7 = scmp.ge.s32.totalorder %s951_s24, 4   ;;  %s1201_s12 = smov %s858_s13 }
 0x172   : > { %s1202_s13 = smov %s862_s14  ;;  %s1203_s14 = smov %s985_s17 }
 0x173   : > { %s1204_s15 = smov %s951_s24  ;;  %19 = sbr.rel (!%p17_p7) target bundleno = 6 (0x6), region = 81 }
 0x17a   :  { %460 = vsyncpa [#allocation3], 1 }
 0x17b   :  { %462 = vsyncpa [#allocation3 + $0x1], 1 }
 0x17c   :  { %463 = vsyncpa [#allocation6], 1 }
 0x17d   :  { %464 = vsyncpa [#allocation4], 1 }
 0x17e   :  { %466 = vsyncpa [#allocation4 + $0x1], 1 }

</bundles_post_ra>
